<compile_context>
chip_gen: v6e
topology: v6e:2x2x1
jax: 0.10.0
libtpu: 0.0.40
codegen_flags: <defaults>
</compile_context>

<pallas_src>
import jax
import jax.numpy as jnp
from jax.experimental import pallas as pl
from jax.experimental.pallas import tpu as pltpu

EPS = 1e-5
LANE = 128


def _round_up(v, m):
    return ((v + m - 1) // m) * m


def _pad_axis(a, axis, mult):
    pad = (-a.shape[axis]) % mult
    if pad == 0:
        return a
    widths = [(0, 0)] * a.ndim
    widths[axis] = (0, pad)
    return jnp.pad(a, widths)


def _choose_tile_n(n):
    """Row-tile size: small batches stay single-digit grids; large batches use
    512-row tiles for better DMA efficiency while staying well under VMEM."""
    n_pad = _round_up(max(n, 1), LANE)
    if n_pad <= 512:
        return 128
    if n_pad <= 2048:
        return 256
    return 512


# ---------------- pass 1: full-batch BN statistics ----------------
def stats_kernel(x_ref, w1t_ref, psum_ref, psumsq_ref):
    # (TILE_N, IN_P) bf16 @ (IN_P, HID_P) bf16 -> f32 accumulate on the MXU.
    h = jnp.dot(x_ref[...], w1t_ref[...], preferred_element_type=jnp.float32)
    # Column reductions on the MXU (ones @ h) instead of cross-sublane XLU
    # reduces; every one of the 8 result rows equals the full column sum.
    ones = jnp.ones((8, h.shape[0]), dtype=jnp.float32)
    psum_ref[0] = jnp.dot(ones, h, preferred_element_type=jnp.float32)
    psumsq_ref[0] = jnp.dot(ones, h * h, preferred_element_type=jnp.float32)


# ---------------- pass 2: normalize + relu + second matmul ----------------
def fwd_kernel(x_ref, w1t_ref, w2t_ref, scale_ref, shift_ref, o_ref):
    h = jnp.dot(x_ref[...], w1t_ref[...], preferred_element_type=jnp.float32)
    # Training-mode BatchNorm1d folded into one per-feature FMA.
    h = jnp.maximum(h * scale_ref[...] + shift_ref[...], 0.0)
    y = jnp.dot(h.astype(jnp.bfloat16), w2t_ref[...],
                preferred_element_type=jnp.float32)
    o_ref[...] = y.astype(o_ref.dtype)


@jax.jit
def mlp_forward(x, w1, w2, gamma, beta):
    """x: (N, in_dim); w1: (hidden, in_dim); w2: (out_dim, hidden)."""
    n, _ = x.shape
    out_dim = w2.shape[0]
    tile_n = _choose_tile_n(n)

    # Pre-transpose + lane-pad + bf16-cast the weights once (constant-folded
    # under jit; callers that reuse weights should cache these).
    w1t = _pad_axis(_pad_axis(w1.T, 0, LANE), 1, LANE).astype(jnp.bfloat16)
    w2t = _pad_axis(_pad_axis(w2.T, 0, LANE), 1, LANE).astype(jnp.bfloat16)
    gamma_p = _pad_axis(gamma, 0, LANE).astype(jnp.float32)
    beta_p = _pad_axis(beta, 0, LANE).astype(jnp.float32)

    xp = _pad_axis(_pad_axis(x, 0, tile_n), 1, LANE).astype(jnp.bfloat16)
    n_p, in_p = xp.shape
    hid_p = w1t.shape[1]
    out_p = w2t.shape[1]
    grid_n = n_p // tile_n

    cparams = pltpu.CompilerParams(
        dimension_semantics=("parallel",),
        vmem_limit_bytes=32 * 1024 * 1024)

    # Pass 1: per-tile partial sums / sums-of-squares of h over the batch.
    psum, psumsq = pl.pallas_call(
        stats_kernel,
        out_shape=(jax.ShapeDtypeStruct((grid_n, 8, hid_p), jnp.float32),
                   jax.ShapeDtypeStruct((grid_n, 8, hid_p), jnp.float32)),
        grid_spec=pltpu.PrefetchScalarGridSpec(
            num_scalar_prefetch=0,
            grid=(grid_n,),
            in_specs=[pl.BlockSpec((tile_n, in_p), lambda i: (i, 0)),
                      pl.BlockSpec((in_p, hid_p), lambda i: (0, 0))],
            out_specs=[pl.BlockSpec((1, 8, hid_p), lambda i: (i, 0, 0)),
                       pl.BlockSpec((1, 8, hid_p), lambda i: (i, 0, 0))]),
        compiler_params=cparams,
    )(xp, w1t)

    # Tiny XLA glue: fold training-mode BatchNorm1d into scale/shift.
    col_sum = jnp.sum(psum[:, 0, :], axis=0)                 # (hid_p,)
    col_sumsq = jnp.sum(psumsq[:, 0, :], axis=0)
    inv_n = jnp.float32(1.0 / n)                             # true N, not padded
    mean = col_sum * inv_n
    var = jnp.maximum(col_sumsq * inv_n - mean * mean, 0.0)  # biased variance
    scale = gamma_p * jax.lax.rsqrt(var + EPS)
    shift = beta_p - mean * scale
    scale2d = scale.reshape(1, hid_p)
    shift2d = shift.reshape(1, hid_p)

    # Pass 2: normalize + ReLU + second matmul, lane-dense (N_P, 128k) output.
    y_pad = pl.pallas_call(
        fwd_kernel,
        out_shape=jax.ShapeDtypeStruct((n_p, out_p), jnp.float32),
        grid_spec=pltpu.PrefetchScalarGridSpec(
            num_scalar_prefetch=0,
            grid=(grid_n,),
            in_specs=[pl.BlockSpec((tile_n, in_p), lambda i: (i, 0)),
                      pl.BlockSpec((in_p, hid_p), lambda i: (0, 0)),
                      pl.BlockSpec((hid_p, out_p), lambda i: (0, 0)),
                      pl.BlockSpec((1, hid_p), lambda i: (0, 0)),
                      pl.BlockSpec((1, hid_p), lambda i: (0, 0))],
            out_specs=pl.BlockSpec((tile_n, out_p), lambda i: (i, 0))),
        compiler_params=cparams,
    )(xp, w1t, w2t, scale2d, shift2d)

    return y_pad[:n, :out_dim]


def mlp_reference(x, w1, w2, gamma, beta):
    h = jnp.dot(x, w1.T, precision=jax.lax.Precision.HIGHEST)
    mean = jnp.mean(h, axis=0)
    var = jnp.mean((h - mean) ** 2, axis=0)
    h = (h - mean) / jnp.sqrt(var + EPS) * gamma + beta
    h = jnp.maximum(h, 0.0)
    return jnp.dot(h, w2.T, precision=jax.lax.Precision.HIGHEST)


if __name__ == "__main__":
    # decision_layer = MLP(embed_dim * (n_layers + 1), embed_dim, out_dim)
    embed_dim, n_layers, out_dim = 32, 3, 1
    input_dim = embed_dim * (n_layers + 1)   # 128
    hidden_dim = embed_dim                   # 32
    output_dim = out_dim                     # 1
    n = 300  # nodes; non-multiple of 128 to exercise padding + multi-tile grid

    key = jax.random.PRNGKey(0)
    kx, kw1, kw2, kg, kb = jax.random.split(key, 5)

    x = jax.random.normal(kx, (n, input_dim), dtype=jnp.float32)
    # nn.Linear(input_dim, hidden_dim, bias=False).weight: (hidden, input)
    w1 = jax.random.normal(kw1, (hidden_dim, input_dim), dtype=jnp.float32) * 0.1
    # nn.Linear(hidden_dim, output_dim, bias=False).weight: (output, hidden)
    w2 = jax.random.normal(kw2, (output_dim, hidden_dim), dtype=jnp.float32) * 0.1
    # BatchNorm1d affine params (non-trivial values to exercise the BN fold)
    gamma = 1.0 + 0.1 * jax.random.normal(kg, (hidden_dim,), dtype=jnp.float32)
    beta = 0.1 * jax.random.normal(kb, (hidden_dim,), dtype=jnp.float32)

    out = jax.block_until_ready(mlp_forward(x, w1, w2, gamma, beta))

    # Reference on the same bf16-rounded MXU operands, all math in f32.
    xr = x.astype(jnp.bfloat16).astype(jnp.float32)
    w1r = w1.astype(jnp.bfloat16).astype(jnp.float32)
    w2r = w2.astype(jnp.bfloat16).astype(jnp.float32)
    ref = mlp_reference(xr, w1r, w2r, gamma, beta)

    assert out.shape == (n, output_dim)
    assert jnp.allclose(out, ref, atol=1e-2, rtol=1e-2), "mismatch vs reference"

    print("KERNEL_OK")
</pallas_src>

<mosaic_0001>
module attributes {stable_mosaic.version = 11 : i64} {
  func.func @stats_kernel(%arg0: i32, %arg1: memref<128x128xbf16, #tpu.memory_space<vmem>>, %arg2: memref<128x128xbf16, #tpu.memory_space<vmem>>, %arg3: memref<1x8x128xf32, #tpu.memory_space<vmem>>, %arg4: memref<1x8x128xf32, #tpu.memory_space<vmem>>) attributes {dimension_semantics = [#tpu.dimension_semantics<parallel>], iteration_bounds = array<i64: 3>, scalar_prefetch = 0 : i64, scratch_operands = 0 : i64, tpu.core_type = #tpu.core_type<tc>, window_params = [{transform_indices = @transform_0, window_bounds = array<i64: 128, 128>}, {pipeline_mode = #tpu.pipeline_mode<synchronous>, transform_indices = @transform_1, window_bounds = array<i64: 128, 128>}, {transform_indices = @transform_2, window_bounds = array<i64: 1, 8, 128>}, {transform_indices = @transform_3, window_bounds = array<i64: 1, 8, 128>}]} {
    %c0 = arith.constant 0 : index
    %c0_0 = arith.constant 0 : index
    %0 = vector.load %arg1[%c0, %c0_0] : memref<128x128xbf16, #tpu.memory_space<vmem>>, vector<128x128xbf16>
    %c0_1 = arith.constant 0 : index
    %c0_2 = arith.constant 0 : index
    %1 = vector.load %arg2[%c0_1, %c0_2] : memref<128x128xbf16, #tpu.memory_space<vmem>>, vector<128x128xbf16>
    %cst = arith.constant dense<0.000000e+00> : vector<128x128xf32>
    %2 = tpu.matmul %0, %1, %cst {dimension_numbers = #tpu.dot_dimension_numbers<[1], [0], [0], [1], [0, 0, 1, 1], [], []>} : vector<128x128xbf16>, vector<128x128xbf16>, vector<128x128xf32> -> vector<128x128xf32>
    %cst_3 = arith.constant 1.000000e+00 : f32
    %3 = vector.broadcast %cst_3 : f32 to vector<8x128xf32>
    %cst_4 = arith.constant dense<0.000000e+00> : vector<8x128xf32>
    %4 = tpu.matmul %3, %2, %cst_4 {dimension_numbers = #tpu.dot_dimension_numbers<[1], [0], [0], [1], [0, 0, 1, 1], [], []>} : vector<8x128xf32>, vector<128x128xf32>, vector<8x128xf32> -> vector<8x128xf32>
    %c0_5 = arith.constant 0 : index
    %c0_6 = arith.constant 0 : index
    %c0_7 = arith.constant 0 : index
    %5 = vector.load %arg3[%c0_5, %c0_6, %c0_7] : memref<1x8x128xf32, #tpu.memory_space<vmem>>, vector<1x8x128xf32>
    %6 = vector.shape_cast %5 : vector<1x8x128xf32> to vector<8x128xf32>
    %7 = vector.shape_cast %4 : vector<8x128xf32> to vector<1x8x128xf32>
    tpu.vector_store %arg3[%c0_5, %c0_6, %c0_7], %7 {strides = array<i32>} : memref<1x8x128xf32, #tpu.memory_space<vmem>>, vector<1x8x128xf32>,
    %8 = arith.mulf %2, %2 : vector<128x128xf32>
    %cst_8 = arith.constant dense<0.000000e+00> : vector<8x128xf32>
    %9 = tpu.matmul %3, %8, %cst_8 {dimension_numbers = #tpu.dot_dimension_numbers<[1], [0], [0], [1], [0, 0, 1, 1], [], []>} : vector<8x128xf32>, vector<128x128xf32>, vector<8x128xf32> -> vector<8x128xf32>
    %c0_9 = arith.constant 0 : index
    %c0_10 = arith.constant 0 : index
    %c0_11 = arith.constant 0 : index
    %10 = vector.load %arg4[%c0_9, %c0_10, %c0_11] : memref<1x8x128xf32, #tpu.memory_space<vmem>>, vector<1x8x128xf32>
    %11 = vector.shape_cast %10 : vector<1x8x128xf32> to vector<8x128xf32>
    %12 = vector.shape_cast %9 : vector<8x128xf32> to vector<1x8x128xf32>
    tpu.vector_store %arg4[%c0_9, %c0_10, %c0_11], %12 {strides = array<i32>} : memref<1x8x128xf32, #tpu.memory_space<vmem>>, vector<1x8x128xf32>,
    return
  }
  func.func @transform_0(%arg0: i32) -> (i32, i32) {
    %c0_i32 = arith.constant 0 : i32
    %c0_i32_0 = arith.constant 0 : i32
    return %arg0, %c0_i32 : i32, i32
  }
  func.func @transform_1(%arg0: i32) -> (i32, i32) {
    %c0_i32 = arith.constant 0 : i32
    %c0_i32_0 = arith.constant 0 : i32
    %c0_i32_1 = arith.constant 0 : i32
    return %c0_i32, %c0_i32_0 : i32, i32
  }
  func.func @transform_2(%arg0: i32) -> (i32, i32, i32) {
    %c0_i32 = arith.constant 0 : i32
    %c0_i32_0 = arith.constant 0 : i32
    %c0_i32_1 = arith.constant 0 : i32
    return %arg0, %c0_i32, %c0_i32_0 : i32, i32, i32
  }
  func.func @transform_3(%arg0: i32) -> (i32, i32, i32) {
    %c0_i32 = arith.constant 0 : i32
    %c0_i32_0 = arith.constant 0 : i32
    %c0_i32_1 = arith.constant 0 : i32
    return %arg0, %c0_i32, %c0_i32_0 : i32, i32, i32
  }
}

module attributes {stable_mosaic.version = 11 : i64} {
  func.func @fwd_kernel(%arg0: i32, %arg1: memref<128x128xbf16, #tpu.memory_space<vmem>>, %arg2: memref<128x128xbf16, #tpu.memory_space<vmem>>, %arg3: memref<128x128xbf16, #tpu.memory_space<vmem>>, %arg4: memref<1x128xf32, #tpu.memory_space<vmem>>, %arg5: memref<1x128xf32, #tpu.memory_space<vmem>>, %arg6: memref<128x128xf32, #tpu.memory_space<vmem>>) attributes {dimension_semantics = [#tpu.dimension_semantics<parallel>], iteration_bounds = array<i64: 3>, scalar_prefetch = 0 : i64, scratch_operands = 0 : i64, tpu.core_type = #tpu.core_type<tc>, window_params = [{transform_indices = @transform_0, window_bounds = array<i64: 128, 128>}, {pipeline_mode = #tpu.pipeline_mode<synchronous>, transform_indices = @transform_1, window_bounds = array<i64: 128, 128>}, {pipeline_mode = #tpu.pipeline_mode<synchronous>, transform_indices = @transform_2, window_bounds = array<i64: 128, 128>}, {pipeline_mode = #tpu.pipeline_mode<synchronous>, transform_indices = @transform_3, window_bounds = array<i64: 1, 128>}, {pipeline_mode = #tpu.pipeline_mode<synchronous>, transform_indices = @transform_4, window_bounds = array<i64: 1, 128>}, {transform_indices = @transform_5, window_bounds = array<i64: 128, 128>}]} {
    %c0 = arith.constant 0 : index
    %c0_0 = arith.constant 0 : index
    %0 = vector.load %arg1[%c0, %c0_0] : memref<128x128xbf16, #tpu.memory_space<vmem>>, vector<128x128xbf16>
    %c0_1 = arith.constant 0 : index
    %c0_2 = arith.constant 0 : index
    %1 = vector.load %arg2[%c0_1, %c0_2] : memref<128x128xbf16, #tpu.memory_space<vmem>>, vector<128x128xbf16>
    %cst = arith.constant dense<0.000000e+00> : vector<128x128xf32>
    %2 = tpu.matmul %0, %1, %cst {dimension_numbers = #tpu.dot_dimension_numbers<[1], [0], [0], [1], [0, 0, 1, 1], [], []>} : vector<128x128xbf16>, vector<128x128xbf16>, vector<128x128xf32> -> vector<128x128xf32>
    %c0_3 = arith.constant 0 : index
    %c0_4 = arith.constant 0 : index
    %3 = vector.load %arg4[%c0_3, %c0_4] : memref<1x128xf32, #tpu.memory_space<vmem>>, vector<1x128xf32>
    %4 = vector.broadcast %3 : vector<1x128xf32> to vector<128x128xf32>
    %5 = arith.mulf %2, %4 : vector<128x128xf32>
    %c0_5 = arith.constant 0 : index
    %c0_6 = arith.constant 0 : index
    %6 = vector.load %arg5[%c0_5, %c0_6] : memref<1x128xf32, #tpu.memory_space<vmem>>, vector<1x128xf32>
    %7 = vector.broadcast %6 : vector<1x128xf32> to vector<128x128xf32>
    %8 = arith.addf %5, %7 : vector<128x128xf32>
    %cst_7 = arith.constant 0.000000e+00 : f32
    %9 = vector.broadcast %cst_7 : f32 to vector<128x128xf32>
    %10 = arith.maximumf %8, %9 : vector<128x128xf32>
    %11 = arith.truncf %10 : vector<128x128xf32> to vector<128x128xbf16>
    %c0_8 = arith.constant 0 : index
    %c0_9 = arith.constant 0 : index
    %12 = vector.load %arg3[%c0_8, %c0_9] : memref<128x128xbf16, #tpu.memory_space<vmem>>, vector<128x128xbf16>
    %cst_10 = arith.constant dense<0.000000e+00> : vector<128x128xf32>
    %13 = tpu.matmul %11, %12, %cst_10 {dimension_numbers = #tpu.dot_dimension_numbers<[1], [0], [0], [1], [0, 0, 1, 1], [], []>} : vector<128x128xbf16>, vector<128x128xbf16>, vector<128x128xf32> -> vector<128x128xf32>
    %c0_11 = arith.constant 0 : index
    %c0_12 = arith.constant 0 : index
    %14 = vector.load %arg6[%c0_11, %c0_12] : memref<128x128xf32, #tpu.memory_space<vmem>>, vector<128x128xf32>
    tpu.vector_store %arg6[%c0_11, %c0_12], %13 {strides = array<i32>} : memref<128x128xf32, #tpu.memory_space<vmem>>, vector<128x128xf32>,
    return
  }
  func.func @transform_0(%arg0: i32) -> (i32, i32) {
    %c0_i32 = arith.constant 0 : i32
    %c0_i32_0 = arith.constant 0 : i32
    return %arg0, %c0_i32 : i32, i32
  }
  func.func @transform_1(%arg0: i32) -> (i32, i32) {
    %c0_i32 = arith.constant 0 : i32
    %c0_i32_0 = arith.constant 0 : i32
    %c0_i32_1 = arith.constant 0 : i32
    return %c0_i32, %c0_i32_0 : i32, i32
  }
  func.func @transform_2(%arg0: i32) -> (i32, i32) {
    %c0_i32 = arith.constant 0 : i32
    %c0_i32_0 = arith.constant 0 : i32
    %c0_i32_1 = arith.constant 0 : i32
    return %c0_i32, %c0_i32_0 : i32, i32
  }
  func.func @transform_3(%arg0: i32) -> (i32, i32) {
    %c0_i32 = arith.constant 0 : i32
    %c0_i32_0 = arith.constant 0 : i32
    %c0_i32_1 = arith.constant 0 : i32
    return %c0_i32, %c0_i32_0 : i32, i32
  }
  func.func @transform_4(%arg0: i32) -> (i32, i32) {
    %c0_i32 = arith.constant 0 : i32
    %c0_i32_0 = arith.constant 0 : i32
    %c0_i32_1 = arith.constant 0 : i32
    return %c0_i32, %c0_i32_0 : i32, i32
  }
  func.func @transform_5(%arg0: i32) -> (i32, i32) {
    %c0_i32 = arith.constant 0 : i32
    %c0_i32_0 = arith.constant 0 : i32
    return %arg0, %c0_i32 : i32, i32
  }
}

</mosaic_0001>

<bundles_post_ra>
// kernel: mlp_forward.2
= control target key start
LH: loop header
LB: loop body
LE: loop exit
PB: predicated region body
PF: predicated region fallthrough
CT: control target
= control target key end

     0   :  { %s887_s12 = smov 0   ;;  %s1005_s0 = inlined_call_operand.vmem [shape: bf16[384,128], index: 0, kind: input, shape index: {}]   ;;  %s1006_s1 = inlined_call_operand.vmem [shape: bf16[128,128], index: 1, kind: input, shape index: {}]   ;;  %s1007_s2 = inlined_call_operand.vmem [shape: f32[3,8,128], index: 2, kind: output, shape index: {0}]   ;;  %s1008_s3 = inlined_call_operand.vmem [shape: f32[3,8,128], index: 3, kind: output, shape index: {1}]  }
   0x1 LB: > { %s893_s13 = sadd.s32 4294967295, %s862_s12   ;;  %p654_p0 = scmp.ge.s32.totalorder %s862_s12, 1  ;;  %s862_s12 = sphi %s887_s12, %s14_s12  }
   0x2   : > { %p141_p1 = scmp.lt.s32.totalorder %s862_s12, 4 }
   0x4   : > { %p142_p2 = pnand %p654_p0, %p141_p1 }
   0x5   : > { %s655_s16 = sshll.u32 (!%p142_p2), %s893_s13, 4  ;;  %p174_p4 = scmp.lt.s32.totalorder (!%p142_p2), %s893_s13, 2 }
   0x6   : > { %145 = sbr.rel (%p142_p2) target bundleno = 493 (0x1ed), region = 28  ;;  %p169_p3 = scmp.lt.s32.totalorder (!%p142_p2), %s655_s16, 47 }
   0xb   : > { %v840_v0 = vld [vmem:[%s1006_s1 + $0x38] sm:$0xff]   ;;  %v841_v1 = vld [vmem:[%s1006_s1 + $0x30] sm:$0xff]   ;;  %s1010_s16 = smov (!%p169_p3, %s655_s16), 47  ;;  %v842_v2 = vld [vmem:[%s1006_s1 + $0x28] sm:$0xff]   ;;  %v864_v16 = vmov 0.0   ;;  %vm865_vm0 = vmmov 0  }
   0xc   : > { %727 = vmatprep.subr.bf16.mxu0 %v840_v0  ;;  %s656_s21 = sshll.u32 %s1010_s16, 2  ;;  %v843_v3 = vld [vmem:[%s1006_s1 + $0x20] sm:$0xff]   ;;  %v844_v5 = vld [vmem:[%s1006_s1 + $0x18] sm:$0xff]   ;;  %v845_v6 = vld [vmem:[%s1006_s1 + $0x10] sm:$0xff]   ;;  %759 = vmatprep.subr.mxu1 %v864_v16  ;;  %v866_v49 = vmov 1.0   ;;  %s1012_s13 = smov (!%p174_p4, %s893_s13), 2 }
   0xd   : > { %728 = vmatpush3.bf16.msra.mxu0 %v840_v0  ;;  %s910_s24 = scalar_lea.vmem %s1005_s0, %s656_s21  ;;  %v846_v7 = vld [vmem:[%s1006_s1 + $0x8] sm:$0xff]   ;;  %v847_v8 = vld [vmem:[%s1006_s1] sm:$0xff]   ;;  %791 = vmatprep.mubr.msk.f32.mxu1 %vm865_vm0, %v864_v16  ;;  %s657_s8 = sshll.u32 %s1012_s13, 3 }
   0xe   : > { %729 = vmatprep.subr.bf16.mxu0 %v841_v1  ;;  %v848_v4 = vld [vmem:[%s910_s24] sm:$0xff]   ;;  %v849_v9 = vld [vmem:[%s910_s24 + $0x8] sm:$0xff]   ;;  %v850_v10 = vld [vmem:[%s910_s24 + $0x10] sm:$0xff]   ;;  %s177_s11 = scalar_lea.vmem %s1007_s2, %s657_s8  ;;  %s181_s16 = scalar_lea.vmem %s1008_s3, %s657_s8 }
   0xf   : > { %743 = vmatprep.mubr.bf16.mxu0 %v848_v4  ;;  %v851_v11 = vld [vmem:[%s910_s24 + $0x18] sm:$0xff]   ;;  %v852_v12 = vld [vmem:[%s910_s24 + $0x20] sm:$0xff]   ;;  %v853_v13 = vld [vmem:[%s910_s24 + $0x28] sm:$0xff]  }
  0x10   : > { %v854_v14 = vld [vmem:[%s910_s24 + $0x30] sm:$0xff]   ;;  %v855_v15 = vld [vmem:[%s910_s24 + $0x38] sm:$0xff]  }
  0x11   : > { %730 = vmatpush3.bf16.msra.mxu0 %v841_v1 }
  0x12   : > { %731 = vmatprep.subr.bf16.mxu0 %v842_v2 }
  0x15   : > { %732 = vmatpush3.bf16.msra.mxu0 %v842_v2 }
  0x16   : > { %733 = vmatprep.subr.bf16.mxu0 %v843_v3 }
  0x19   : > { %734 = vmatpush3.bf16.msra.mxu0 %v843_v3 }
  0x1a   : > { %735 = vmatprep.subr.bf16.mxu0 %v844_v5 }
  0x1d   : > { %736 = vmatpush3.bf16.msra.mxu0 %v844_v5 }
  0x1e   : > { %737 = vmatprep.subr.bf16.mxu0 %v845_v6 }
  0x21   : > { %738 = vmatpush3.bf16.msra.mxu0 %v845_v6 }
  0x22   : > { %739 = vmatprep.subr.bf16.mxu0 %v846_v7 }
  0x25   : > { %740 = vmatpush3.bf16.msra.mxu0 %v846_v7 }
  0x26   : > { %741 = vmatprep.subr.bf16.mxu0 %v847_v8 }
  0x29   : > { %742 = vmatpush3.bf16.msra.mxu0 %v847_v8 }
  0x2a   : > { %794 = vmatprep.subr.mxu0 %v864_v16 }
  0x2c   : > { %744 = vmatmul.mubr.bf16.vlgmr.msra.gmra.mxu0 %v849_v9 }
  0x2d   : > { %747 = vmatprep.mubr.bf16.mxu0 %v850_v10 }
  0x34   : > { %748 = vmatmul.mubr.bf16.gmra.mxu0 %v851_v11 }
  0x35   : > { %751 = vmatprep.mubr.bf16.mxu0 %v852_v12 }
  0x3c   : > { %752 = vmatmul.mubr.bf16.gmra.mxu0 %v853_v13 }
  0x3d   : > { %755 = vmatprep.mubr.bf16.mxu0 %v854_v14 }
  0x44   : > { %756 = vmatmul.mubr.bf16.gmra.mxu0 %v855_v15 }
  0x45   : > { %826 = vmatprep.mubr.msk.f32.mxu0 %vm865_vm0, %v864_v16 }
  0xec   : > { %v939_v17 = vpop.f32.mrf.mxu0 }
  0xed   : > { %v481_v46 = vmul.f32 %v939_v17, %v939_v17 }
  0xee   : > { %v941_v18 = vpop.f32.mrf.mxu0 }
  0xef   : > { %v479_v48 = vmul.f32 %v941_v18, %v941_v18 }
  0xf0   : > { %v943_v19 = vpop.f32.mrf.mxu0 }
  0xf1   : > { %v482_v45 = vmul.f32 %v943_v19, %v943_v19 }
  0xf2   : > { %v945_v20 = vpop.f32.mrf.mxu0 }
  0xf3   : > { %v480_v47 = vmul.f32 %v945_v20, %v945_v20 }
  0xf4   : > { %v749_v21 = vpop.f32.mrf.mxu0 }
  0xf5   : > { %v485_v42 = vmul.f32 %v749_v21, %v749_v21 }
  0xf6   : > { %v947_v22 = vpop.f32.mrf.mxu0 }
  0xf7   : > { %v483_v44 = vmul.f32 %v947_v22, %v947_v22 }
  0xf8   : > { %v750_v23 = vpop.f32.mrf.mxu0 }
  0xf9   : > { %v486_v41 = vmul.f32 %v750_v23, %v750_v23 }
  0xfa   : > { %v364_v24 = vpop.f32.mrf.mxu0 }
  0xfb   : > { %v484_v43 = vmul.f32 %v364_v24, %v364_v24 }
  0xfc   : > { %v753_v25 = vpop.f32.mrf.mxu0 }
  0xfd   : > { %v489_v38 = vmul.f32 %v753_v25, %v753_v25 }
  0xfe   : > { %v377_v26 = vpop.f32.mrf.mxu0 }
  0xff   : > { %v487_v40 = vmul.f32 %v377_v26, %v377_v26 }
 0x100   : > { %v754_v27 = vpop.f32.mrf.mxu0 }
 0x101   : > { %v490_v37 = vmul.f32 %v754_v27, %v754_v27 }
 0x102   : > { %v380_v28 = vpop.f32.mrf.mxu0 }
 0x103   : > { %v488_v39 = vmul.f32 %v380_v28, %v380_v28 }
 0x104   : > { %v757_v29 = vpop.f32.mrf.mxu0 }
 0x105   : > { %v493_v34 = vmul.f32 %v757_v29, %v757_v29 }
 0x106   : > { %v393_v30 = vpop.f32.mrf.mxu0 }
 0x107   : > { %v491_v36 = vmul.f32 %v393_v30, %v393_v30 }
 0x108   : > { %v758_v31 = vpop.f32.mrf.mxu0 }
 0x109   : > { %v494_v32 = vmul.f32 %v758_v31, %v758_v31  ;;  %760 = vmatpush3.msra.mxu1 %v758_v31 }
 0x10a   : > { %v396_v33 = vpop.f32.mrf.mxu0  ;;  %761 = vmatprep.subr.mxu1 %v864_v16 }
 0x10b   : > { %762 = vmatpush3.msra.mxu1 %v757_v29  ;;  %795 = vmatpush3.msra.mxu0 %v494_v32  ;;  %v492_v35 = vmul.f32 %v396_v33, %v396_v33 }
 0x10c   : > { %763 = vmatprep.subr.mxu1 %v864_v16  ;;  %796 = vmatprep.subr.mxu0 %v864_v16 }
 0x10d   : > { %764 = vmatpush3.msra.mxu1 %v396_v33  ;;  %797 = vmatpush3.msra.mxu0 %v493_v34 }
 0x10e   : > { %765 = vmatprep.subr.mxu1 %v864_v16  ;;  %798 = vmatprep.subr.mxu0 %v864_v16 }
 0x10f   : > { %766 = vmatpush3.msra.mxu1 %v393_v30  ;;  %799 = vmatpush3.msra.mxu0 %v492_v35 }
 0x110   : > { %767 = vmatprep.subr.mxu1 %v864_v16  ;;  %800 = vmatprep.subr.mxu0 %v864_v16 }
 0x111   : > { %768 = vmatpush3.msra.mxu1 %v754_v27  ;;  %801 = vmatpush3.msra.mxu0 %v491_v36 }
 0x112   : > { %769 = vmatprep.subr.mxu1 %v864_v16  ;;  %802 = vmatprep.subr.mxu0 %v864_v16 }
 0x113   : > { %770 = vmatpush3.msra.mxu1 %v753_v25  ;;  %803 = vmatpush3.msra.mxu0 %v490_v37 }
 0x114   : > { %771 = vmatprep.subr.mxu1 %v864_v16  ;;  %804 = vmatprep.subr.mxu0 %v864_v16 }
 0x115   : > { %772 = vmatpush3.msra.mxu1 %v380_v28  ;;  %805 = vmatpush3.msra.mxu0 %v489_v38 }
 0x116   : > { %773 = vmatprep.subr.mxu1 %v864_v16  ;;  %806 = vmatprep.subr.mxu0 %v864_v16 }
 0x117   : > { %774 = vmatpush3.msra.mxu1 %v377_v26  ;;  %807 = vmatpush3.msra.mxu0 %v488_v39 }
 0x118   : > { %775 = vmatprep.subr.mxu1 %v864_v16  ;;  %808 = vmatprep.subr.mxu0 %v864_v16 }
 0x119   : > { %776 = vmatpush3.msra.mxu1 %v750_v23  ;;  %809 = vmatpush3.msra.mxu0 %v487_v40 }
 0x11a   : > { %777 = vmatprep.subr.mxu1 %v864_v16  ;;  %810 = vmatprep.subr.mxu0 %v864_v16 }
 0x11b   : > { %778 = vmatpush3.msra.mxu1 %v749_v21  ;;  %811 = vmatpush3.msra.mxu0 %v486_v41 }
 0x11c   : > { %779 = vmatprep.subr.mxu1 %v864_v16  ;;  %812 = vmatprep.subr.mxu0 %v864_v16 }
 0x11d   : > { %780 = vmatpush3.msra.mxu1 %v364_v24  ;;  %813 = vmatpush3.msra.mxu0 %v485_v42 }
 0x11e   : > { %781 = vmatprep.subr.mxu1 %v864_v16  ;;  %814 = vmatprep.subr.mxu0 %v864_v16 }
 0x11f   : > { %782 = vmatpush3.msra.mxu1 %v947_v22  ;;  %815 = vmatpush3.msra.mxu0 %v484_v43 }
 0x120   : > { %783 = vmatprep.subr.mxu1 %v864_v16  ;;  %816 = vmatprep.subr.mxu0 %v864_v16 }
 0x121   : > { %784 = vmatpush3.msra.mxu1 %v943_v19  ;;  %817 = vmatpush3.msra.mxu0 %v483_v44 }
 0x122   : > { %785 = vmatprep.subr.mxu1 %v864_v16  ;;  %818 = vmatprep.subr.mxu0 %v864_v16 }
 0x123   : > { %786 = vmatpush3.msra.mxu1 %v939_v17  ;;  %819 = vmatpush3.msra.mxu0 %v482_v45 }
 0x124   : > { %787 = vmatprep.subr.mxu1 %v864_v16  ;;  %820 = vmatprep.subr.mxu0 %v864_v16 }
 0x125   : > { %788 = vmatpush3.msra.mxu1 %v945_v20  ;;  %821 = vmatpush3.msra.mxu0 %v481_v46 }
 0x126   : > { %789 = vmatprep.subr.mxu1 %v864_v16  ;;  %822 = vmatprep.subr.mxu0 %v864_v16 }
 0x127   : > { %790 = vmatpush3.msra.mxu1 %v941_v18  ;;  %823 = vmatpush3.msra.mxu0 %v480_v47 }
 0x128   : > { %824 = vmatprep.subr.mxu0 %v864_v16  ;;  %792 = vmatmul.mubr.f32.vlgmr.msra.gmra.mxu1 %v866_v49 }
 0x129   : > { %825 = vmatpush3.msra.mxu0 %v479_v48 }
 0x12a   : > { %827 = vmatmul.mubr.f32.vlgmr.msra.gmra.mxu0 %v866_v49 }
 0x1e8   : > { %v474_v50 = vpop.f32.mrf.mxu1 }
 0x1e9   : > { %478 = vst [vmem:[%s177_s11] sm:$0xff] %v474_v50 }
 0x1ea   : > { %v561_v51 = vpop.f32.mrf.mxu0  ;;  %v793_v52 = vpop.f32.mrf.mxu1 }
 0x1eb   : > { %565 = vst [vmem:[%s181_s16] sm:$0xff] %v561_v51 }
 0x1ec   : > { %v828_v53 = vpop.f32.mrf.mxu0 }
 0x1ed PF: > { %s14_s12 = sadd.s32 1, %s862_s12  }
 0x1ee   : > { %p11_p5 = scmp.ge.s32.totalorder %s14_s12, 5  }
 0x1f0   :  { %13 = sbr.rel (!%p11_p5) target bundleno = 1 (0x1), region = 70 }

// kernel: mlp_forward.3
= control target key start
LH: loop header
LB: loop body
LE: loop exit
PB: predicated region body
PF: predicated region fallthrough
CT: control target
= control target key end

     0   :  { %s960_s18 = smov 0   ;;  %s1099_s0 = inlined_call_operand.vmem [shape: bf16[384,128], index: 0, kind: input, shape index: {}]   ;;  %s1100_s1 = inlined_call_operand.vmem [shape: bf16[128,128], index: 1, kind: input, shape index: {}]   ;;  %s1101_s2 = inlined_call_operand.vmem [shape: bf16[128,128], index: 2, kind: input, shape index: {}]   ;;  %s1102_s3 = inlined_call_operand.vmem [shape: f32[1,128], index: 3, kind: input, shape index: {}]   ;;  %s1103_s4 = inlined_call_operand.vmem [shape: f32[1,128], index: 4, kind: input, shape index: {}]   ;;  %s1104_s5 = inlined_call_operand.vmem [shape: f32[384,128], index: 5, kind: output, shape index: {}]  }
   0x1 LB: > { %s757_s19 = sadd.s32 4294967295, %s928_s18   ;;  %p761_p0 = scmp.ge.s32.totalorder %s928_s18, 1  ;;  %s928_s18 = sphi %s960_s18, %s15_s18  }
   0x2   : > { %p188_p1 = scmp.lt.s32.totalorder %s928_s18, 4 }
   0x4   : > { %p189_p2 = pnand %p761_p0, %p188_p1 }
   0x5   : > { %s762_s22 = sshll.u32 (!%p189_p2), %s757_s19, 4 }
   0x6   : > { %192 = sbr.rel (%p189_p2) target bundleno = 476 (0x1dc), region = 40  ;;  %p217_p3 = scmp.lt.s32.totalorder (!%p189_p2), %s762_s22, 47 }
   0xb   : > { %v898_v0 = vld [vmem:[%s1100_s1 + $0x38] sm:$0xff]   ;;  %v899_v1 = vld [vmem:[%s1100_s1 + $0x30] sm:$0xff]   ;;  %s1106_s22 = smov (!%p217_p3, %s762_s22), 47  ;;  %v900_v2 = vld [vmem:[%s1100_s1 + $0x28] sm:$0xff]  }
   0xc   : > { %826 = vmatprep.subr.bf16.mxu0 %v898_v0  ;;  %s763_s27 = sshll.u32 %s1106_s22, 2  ;;  %v901_v3 = vld [vmem:[%s1100_s1 + $0x20] sm:$0xff]   ;;  %v902_v5 = vld [vmem:[%s1100_s1 + $0x18] sm:$0xff]   ;;  %v903_v6 = vld [vmem:[%s1100_s1 + $0x10] sm:$0xff]   ;;  %s765_s13 = sshll.u32 %s1106_s22, 3 }
   0xd   : > { %827 = vmatpush3.bf16.msra.mxu0 %v898_v0  ;;  %s983_s30 = scalar_lea.vmem %s1099_s0, %s763_s27  ;;  %v914_v7 = vld [vmem:[%s1101_s2 + $0x38] sm:$0xff]   ;;  %v915_v8 = vld [vmem:[%s1101_s2 + $0x30] sm:$0xff]   ;;  %v904_v9 = vld [vmem:[%s1100_s1 + $0x8] sm:$0xff]   ;;  %s1078_s16 = scalar_lea.vmem %s1104_s5, %s765_s13 }
   0xe   : > { %828 = vmatprep.subr.bf16.mxu0 %v899_v1  ;;  %v906_v4 = vld [vmem:[%s983_s30] sm:$0xff]   ;;  %858 = vmatprep.subr.bf16.mxu1 %v914_v7  ;;  %v916_v10 = vld [vmem:[%s1101_s2 + $0x28] sm:$0xff]   ;;  %v908_v14 = vld [vmem:[%s983_s30 + $0x10] sm:$0xff]  }
   0xf   : > { %842 = vmatprep.mubr.bf16.mxu0 %v906_v4  ;;  %859 = vmatpush3.bf16.msra.mxu1 %v914_v7  ;;  %v905_v11 = vld [vmem:[%s1100_s1] sm:$0xff]   ;;  %v907_v13 = vld [vmem:[%s983_s30 + $0x8] sm:$0xff]   ;;  %v909_v15 = vld [vmem:[%s983_s30 + $0x18] sm:$0xff]  }
  0x10   : > { %860 = vmatprep.subr.bf16.mxu1 %v915_v8  ;;  %v917_v12 = vld [vmem:[%s1101_s2 + $0x20] sm:$0xff]   ;;  %v911_v17 = vld [vmem:[%s983_s30 + $0x28] sm:$0xff]   ;;  %v912_v18 = vld [vmem:[%s983_s30 + $0x30] sm:$0xff]  }
  0x11   : > { %829 = vmatpush3.bf16.msra.mxu0 %v899_v1  ;;  %v910_v16 = vld [vmem:[%s983_s30 + $0x20] sm:$0xff]   ;;  %v913_v19 = vld [vmem:[%s983_s30 + $0x38] sm:$0xff]   ;;  %v919_v21 = vld [vmem:[%s1101_s2 + $0x10] sm:$0xff]  }
  0x12   : > { %830 = vmatprep.subr.bf16.mxu0 %v900_v2  ;;  %v918_v20 = vld [vmem:[%s1101_s2 + $0x18] sm:$0xff]   ;;  %v920_v22 = vld [vmem:[%s1101_s2 + $0x8] sm:$0xff]   ;;  %v921_v23 = vld [vmem:[%s1101_s2] sm:$0xff]  }
  0x13   : > { %861 = vmatpush3.bf16.msra.mxu1 %v915_v8  ;;  %v1035_v25 = vld [vmem:[%s1102_s3] ss:$0 sm:$0xff] }
  0x14   : > { %862 = vmatprep.subr.bf16.mxu1 %v916_v10  ;;  %v1042_v30 = vld [vmem:[%s1103_s4] ss:$0 sm:$0xff] }
  0x15   : > { %831 = vmatpush3.bf16.msra.mxu0 %v900_v2 }
  0x16   : > { %832 = vmatprep.subr.bf16.mxu0 %v901_v3 }
  0x17   : > { %863 = vmatpush3.bf16.msra.mxu1 %v916_v10 }
  0x18   : > { %864 = vmatprep.subr.bf16.mxu1 %v917_v12 }
  0x19   : > { %833 = vmatpush3.bf16.msra.mxu0 %v901_v3 }
  0x1a   : > { %834 = vmatprep.subr.bf16.mxu0 %v902_v5 }
  0x1b   : > { %865 = vmatpush3.bf16.msra.mxu1 %v917_v12 }
  0x1c   : > { %866 = vmatprep.subr.bf16.mxu1 %v918_v20 }
  0x1d   : > { %835 = vmatpush3.bf16.msra.mxu0 %v902_v5 }
  0x1e   : > { %836 = vmatprep.subr.bf16.mxu0 %v903_v6 }
  0x1f   : > { %867 = vmatpush3.bf16.msra.mxu1 %v918_v20 }
  0x20   : > { %868 = vmatprep.subr.bf16.mxu1 %v919_v21 }
  0x21   : > { %837 = vmatpush3.bf16.msra.mxu0 %v903_v6 }
  0x22   : > { %838 = vmatprep.subr.bf16.mxu0 %v904_v9 }
  0x23   : > { %869 = vmatpush3.bf16.msra.mxu1 %v919_v21 }
  0x24   : > { %870 = vmatprep.subr.bf16.mxu1 %v920_v22 }
  0x25   : > { %839 = vmatpush3.bf16.msra.mxu0 %v904_v9 }
  0x26   : > { %840 = vmatprep.subr.bf16.mxu0 %v905_v11 }
  0x27   : > { %871 = vmatpush3.bf16.msra.mxu1 %v920_v22 }
  0x28   : > { %872 = vmatprep.subr.bf16.mxu1 %v921_v23 }
  0x29   : > { %841 = vmatpush3.bf16.msra.mxu0 %v905_v11 }
  0x2b   : > { %873 = vmatpush3.bf16.msra.mxu1 %v921_v23 }
  0x2c   : > { %843 = vmatmul.mubr.bf16.vlgmr.msra.gmra.mxu0 %v907_v13 }
  0x2d   : > { %846 = vmatprep.mubr.bf16.mxu0 %v908_v14 }
  0x34   : > { %847 = vmatmul.mubr.bf16.gmra.mxu0 %v909_v15 }
  0x35   : > { %850 = vmatprep.mubr.bf16.mxu0 %v910_v16 }
  0x3c   : > { %851 = vmatmul.mubr.bf16.gmra.mxu0 %v911_v17 }
  0x3d   : > { %854 = vmatprep.mubr.bf16.mxu0 %v912_v18 }
  0x44   : > { %855 = vmatmul.mubr.bf16.gmra.mxu0 %v913_v19 }
  0xec   : > { %v844_v24 = vpop.f32.mrf.mxu0 }
  0xed   : > { %v463_v28 = vmul.f32 %v844_v24, %v1035_v25 }
  0xee   : > { %v391_v26 = vpop.f32.mrf.mxu0 }
  0xef   : > { %v461_v27 = vmul.f32 %v1035_v25, %v391_v26  ;;  %v486_v36 = vadd.f32 %v1042_v30, %v463_v28 }
  0xf0   : > { %v845_v29 = vpop.f32.mrf.mxu0 }
  0xf1   : > { %v464_v31 = vmul.f32 %v845_v29, %v1035_v25  ;;  %v484_v35 = vadd.f32 %v1042_v30, %v461_v27  ;;  %v502_v44 = vmax.f32 %v486_v36, 0.0 }
  0xf2   : > { %v394_v32 = vpop.f32.mrf.mxu0 }
  0xf3   : > { %v487_v33 = vadd.f32 %v1042_v30, %v464_v31  ;;  %v462_v34 = vmul.f32 %v1035_v25, %v394_v32  ;;  %v500_v42 = vmax.f32 %v484_v35, 0.0 }
  0xf4   : > { %v848_v37 = vpop.f32.mrf.mxu0 }
  0xf5   : > { %v485_v38 = vadd.f32 %v1042_v30, %v462_v34  ;;  %v503_v39 = vmax.f32 %v487_v33, 0.0  ;;  %v467_v45 = vmul.f32 %v848_v37, %v1035_v25 }
  0xf6   : > { %v407_v40 = vpop.f32.mrf.mxu0 }
  0xf7   : > { %v465_v41 = vmul.f32 %v1035_v25, %v407_v40  ;;  %v501_v43 = vmax.f32 %v485_v38, 0.0  ;;  %v517_v50 = vpack.c.bf16 %v503_v39, %v502_v44  ;;  %v490_v54 = vadd.f32 %v1042_v30, %v467_v45 }
  0xf8   : > { %v849_v46 = vpop.f32.mrf.mxu0 }
  0xf9   : > { %v468_v47 = vmul.f32 %v849_v46, %v1035_v25  ;;  %v516_v48 = vpack.c.bf16 %v501_v43, %v500_v42  ;;  %v488_v51 = vadd.f32 %v1042_v30, %v465_v41  ;;  %v506_v62 = vmax.f32 %v490_v54, 0.0 }
  0xfa   : > { %v410_v49 = vpop.f32.mrf.mxu0 }
  0xfb   : > { %v491_v52 = vadd.f32 %v1042_v30, %v468_v47  ;;  %v466_v53 = vmul.f32 %v1035_v25, %v410_v49  ;;  %874 = vmatprep.mubr.bf16.mxu1 %v516_v48  ;;  %v504_v59 = vmax.f32 %v488_v51, 0.0 }
  0xfc   : > { %v852_v55 = vpop.f32.mrf.mxu0  ;;  %875 = vmatmul.mubr.bf16.vlgmr.msra.gmra.mxu1 %v517_v50 }
  0xfd   : > { %v489_v56 = vadd.f32 %v1042_v30, %v466_v53  ;;  %v507_v57 = vmax.f32 %v491_v52, 0.0  ;;  %v471_v63 = vmul.f32 %v852_v55, %v1035_v25 }
  0xfe   : > { %v423_v58 = vpop.f32.mrf.mxu0 }
  0xff   : > { %v505_v60 = vmax.f32 %v489_v56, 0.0  ;;  %v469_v61 = vmul.f32 %v1035_v25, %v423_v58  ;;  %v519_v4 = vpack.c.bf16 %v507_v57, %v506_v62  ;;  %v494_v8 = vadd.f32 %v1042_v30, %v471_v63 }
 0x100   : > { %v853_v0 = vpop.f32.mrf.mxu0 }
 0x101   : > { %v472_v1 = vmul.f32 %v853_v0, %v1035_v25  ;;  %v518_v2 = vpack.c.bf16 %v505_v60, %v504_v59  ;;  %v492_v5 = vadd.f32 %v1042_v30, %v469_v61  ;;  %v510_v16 = vmax.f32 %v494_v8, 0.0 }
 0x102   : > { %v426_v3 = vpop.f32.mrf.mxu0 }
 0x103   : > { %v495_v6 = vadd.f32 %v1042_v30, %v472_v1  ;;  %v470_v7 = vmul.f32 %v1035_v25, %v426_v3  ;;  %878 = vmatprep.mubr.bf16.mxu1 %v518_v2  ;;  %v508_v13 = vmax.f32 %v492_v5, 0.0 }
 0x104   : > { %v856_v9 = vpop.f32.mrf.mxu0  ;;  %879 = vmatmul.mubr.bf16.gmra.mxu1 %v519_v4 }
 0x105   : > { %v493_v10 = vadd.f32 %v1042_v30, %v470_v7  ;;  %v511_v11 = vmax.f32 %v495_v6, 0.0  ;;  %v475_v17 = vmul.f32 %v856_v9, %v1035_v25 }
 0x106   : > { %v439_v12 = vpop.f32.mrf.mxu0 }
 0x107   : > { %v509_v14 = vmax.f32 %v493_v10, 0.0  ;;  %v473_v15 = vmul.f32 %v1035_v25, %v439_v12  ;;  %v521_v22 = vpack.c.bf16 %v511_v11, %v510_v16  ;;  %v498_v27 = vadd.f32 %v1042_v30, %v475_v17 }
 0x108   : > { %v857_v18 = vpop.f32.mrf.mxu0 }
 0x109   : > { %v476_v19 = vmul.f32 %v857_v18, %v1035_v25  ;;  %v520_v20 = vpack.c.bf16 %v509_v14, %v508_v13  ;;  %v496_v23 = vadd.f32 %v1042_v30, %v473_v15  ;;  %v514_v33 = vmax.f32 %v498_v27, 0.0 }
 0x10a   : > { %v442_v21 = vpop.f32.mrf.mxu0 }
 0x10b   : > { %v499_v24 = vadd.f32 %v1042_v30, %v476_v19  ;;  %v474_v26 = vmul.f32 %v1035_v25, %v442_v21  ;;  %882 = vmatprep.mubr.bf16.mxu1 %v520_v20  ;;  %v512_v31 = vmax.f32 %v496_v23, 0.0 }
 0x10c   : > { %883 = vmatmul.mubr.bf16.gmra.mxu1 %v521_v22 }
 0x10d   : > { %v497_v28 = vadd.f32 %v1042_v30, %v474_v26  ;;  %v515_v29 = vmax.f32 %v499_v24, 0.0 }
 0x10f   : > { %v513_v32 = vmax.f32 %v497_v28, 0.0  ;;  %v523_v35 = vpack.c.bf16 %v515_v29, %v514_v33 }
 0x111   : > { %v522_v34 = vpack.c.bf16 %v513_v32, %v512_v31 }
 0x113   : > { %886 = vmatprep.mubr.bf16.mxu1 %v522_v34 }
 0x114   : > { %887 = vmatmul.mubr.bf16.gmra.mxu1 %v523_v35 }
 0x1bc   : > { %v876_v25 = vpop.f32.mrf.mxu1 }
 0x1bd   : > { %687 = vst [vmem:[%s1078_s16 + $0x10] sm:$0xff] %v876_v25 }
 0x1be   : > { %v622_v30 = vpop.f32.mrf.mxu1 }
 0x1bf   : > { %685 = vst [vmem:[%s1078_s16] sm:$0xff] %v622_v30 }
 0x1c0   : > { %v877_v36 = vpop.f32.mrf.mxu1 }
 0x1c1   : > { %688 = vst [vmem:[%s1078_s16 + $0x18] sm:$0xff] %v877_v36 }
 0x1c2   : > { %v625_v37 = vpop.f32.mrf.mxu1 }
 0x1c3   : > { %686 = vst [vmem:[%s1078_s16 + $0x8] sm:$0xff] %v625_v37 }
 0x1c4   : > { %v880_v38 = vpop.f32.mrf.mxu1 }
 0x1c5   : > { %691 = vst [vmem:[%s1078_s16 + $0x30] sm:$0xff] %v880_v38 }
 0x1c6   : > { %v638_v39 = vpop.f32.mrf.mxu1 }
 0x1c7   : > { %689 = vst [vmem:[%s1078_s16 + $0x20] sm:$0xff] %v638_v39 }
 0x1c8   : > { %v881_v40 = vpop.f32.mrf.mxu1 }
 0x1c9   : > { %692 = vst [vmem:[%s1078_s16 + $0x38] sm:$0xff] %v881_v40 }
 0x1ca   : > { %v641_v41 = vpop.f32.mrf.mxu1 }
 0x1cb   : > { %690 = vst [vmem:[%s1078_s16 + $0x28] sm:$0xff] %v641_v41 }
 0x1cc   : > { %v884_v42 = vpop.f32.mrf.mxu1 }
 0x1cd   : > { %695 = vst [vmem:[%s1078_s16 + $0x50] sm:$0xff] %v884_v42 }
 0x1ce   : > { %v654_v43 = vpop.f32.mrf.mxu1 }
 0x1cf   : > { %693 = vst [vmem:[%s1078_s16 + $0x40] sm:$0xff] %v654_v43 }
 0x1d0   : > { %v885_v44 = vpop.f32.mrf.mxu1 }
 0x1d1   : > { %696 = vst [vmem:[%s1078_s16 + $0x58] sm:$0xff] %v885_v44 }
 0x1d2   : > { %v657_v45 = vpop.f32.mrf.mxu1 }
 0x1d3   : > { %694 = vst [vmem:[%s1078_s16 + $0x48] sm:$0xff] %v657_v45 }
 0x1d4   : > { %v888_v46 = vpop.f32.mrf.mxu1 }
 0x1d5   : > { %699 = vst [vmem:[%s1078_s16 + $0x70] sm:$0xff] %v888_v46 }
 0x1d6   : > { %v670_v47 = vpop.f32.mrf.mxu1 }
 0x1d7   : > { %697 = vst [vmem:[%s1078_s16 + $0x60] sm:$0xff] %v670_v47 }
 0x1d8   : > { %v889_v48 = vpop.f32.mrf.mxu1 }
 0x1d9   : > { %700 = vst [vmem:[%s1078_s16 + $0x78] sm:$0xff] %v889_v48 }
 0x1da   : > { %v673_v49 = vpop.f32.mrf.mxu1 }
 0x1db   : > { %698 = vst [vmem:[%s1078_s16 + $0x68] sm:$0xff] %v673_v49 }
 0x1dc PF: > { %s15_s18 = sadd.s32 1, %s928_s18  }
 0x1dd   : > { %p12_p4 = scmp.ge.s32.totalorder %s15_s18, 5  }
 0x1df   :  { %14 = sbr.rel (!%p12_p4) target bundleno = 1 (0x1), region = 70 }

</bundles_post_ra>
